<compile_context>
chip_gen: v7x
topology: tpu7x:2x2x1
jax: 0.10.0
libtpu: 0.0.40
codegen_flags: <defaults>
</compile_context>

<pallas_src>
import numpy as np
import jax
import jax.numpy as jnp
from jax.experimental import pallas as pl
from jax.experimental.pallas import tpu as pltpu

# nn.LeakyReLU(True) -> negative_slope == 1.0 (identity). Kept explicit so the
# reference reproduces PyTorch exactly.  NOTE: the weight fusion below is only
# exact *because* the slope is 1.0; if upstream ever fixes it to 0.01 the conv
# matmuls must stay separate with a real leaky-relu between them.
LEAKY_SLOPE = 1.0


def _round_up(n, m):
    return ((n + m - 1) // m) * m


# ----------------------------------------------------------------------------
# Pallas kernel: fused matmul + ReLU + small head, one batch tile per step.
# ----------------------------------------------------------------------------
def _dd_kernel(x_ref, w1_ref, b1_ref, w2_ref, b2_ref, o_ref):
    # x_ref:  (bt, K)       bf16/f32   K = T*Cin*H*W  (T-sum folded into K)
    # w1_ref: (K, 128)      bf16/f32   fused conv1..3 + dense1, hidden padded to 128
    # b1_ref: (1, 128)      f32
    # w2_ref: (128, Nout)   f32        dense2, padded to lane-dense Nout
    # b2_ref: (1, Nout)     f32
    h = jnp.dot(x_ref[...], w1_ref[...], preferred_element_type=jnp.float32)
    h = jnp.maximum(h + b1_ref[...], 0.0)                       # ReLU(True)
    o = jnp.dot(h, w2_ref[...], preferred_element_type=jnp.float32) + b2_ref[...]
    o_ref[...] = o.astype(o_ref.dtype)


# ----------------------------------------------------------------------------
# Wrapper: 1-D grid over lane/sublane-friendly batch tiles.
# ----------------------------------------------------------------------------
def domain_discriminator_forward(x, params, *, batch_tile=None):
    B, T, Cin, H, W = x.shape
    w1 = params["w_fused"]          # (T*F0, 128)
    b1 = params["b1_pad"]           # (1, 128)
    w2 = params["w2_pad"]           # (128, Nout)
    b2 = params["b2_pad"]           # (1, Nout)
    num_domain = params["num_domain"]

    K = T * Cin * H * W
    assert w1.shape[0] == K, "fused weight was built for a different input shape"
    Nout = w2.shape[1]

    # Flatten (B,T,Cin,H,W) -> (B, T*F0): glue reshape only, no data movement.
    x_flat = x.reshape(B, K).astype(w1.dtype)

    # Batch tile: multiple of 8 sublanes; default caps at 512 rows (sweepable).
    bt = batch_tile if batch_tile is not None else min(512, _round_up(B, 8))
    bt = _round_up(bt, 8)
    B_pad = _round_up(B, bt)
    if B_pad != B:
        x_flat = jnp.pad(x_flat, ((0, B_pad - B), (0, 0)))

    grid = (B_pad // bt,)
    w_map = lambda i: (0, 0)        # weights/biases stay resident across steps

    out = pl.pallas_call(
        _dd_kernel,
        out_shape=jax.ShapeDtypeStruct((B_pad, Nout), jnp.float32),
        grid_spec=pltpu.PrefetchScalarGridSpec(
            num_scalar_prefetch=0,
            grid=grid,
            in_specs=[
                pl.BlockSpec((bt, K), lambda i: (i, 0)),
                pl.BlockSpec(w1.shape, w_map),
                pl.BlockSpec(b1.shape, w_map),
                pl.BlockSpec(w2.shape, w_map),
                pl.BlockSpec(b2.shape, w_map),
            ],
            out_specs=pl.BlockSpec((bt, Nout), lambda i: (i, 0)),
        ),
        compiler_params=pltpu.CompilerParams(
            dimension_semantics=("parallel",)),
    )(x_flat, w1, b1, w2, b2)

    # Slice away batch padding and the lane padding of the output head.
    return out[:B, :num_domain]


# ----------------------------------------------------------------------------
# Parameter setup (deterministic, in-script).
# ----------------------------------------------------------------------------
def _conv_unrolled_matrix(w, H, W, stride=2, pad=2):
    """Exact dense matrix (float64) for Conv2d(Cin,Cout,5,stride=2,padding=2,bias=False).

    w: (Cout, Cin, KH, KW)   (PyTorch layout)
    Returns M of shape (Cin*H*W, Cout*OH*OW) such that, with x flattened in
    (Cin, H, W) order, conv(x).flatten() == x_flat @ M, plus (OH, OW).
    """
    w = np.asarray(w, dtype=np.float64)
    Cout, Cin, KH, KW = w.shape
    OH = (H + 2 * pad - KH) // stride + 1
    OW = (W + 2 * pad - KW) // stride + 1
    M = np.zeros((Cin, H, W, Cout, OH, OW), dtype=np.float64)
    for oh in range(OH):
        for ow in range(OW):
            for kh in range(KH):
                for kw in range(KW):
                    ih = oh * stride + kh - pad
                    iw = ow * stride + kw - pad
                    if 0 <= ih < H and 0 <= iw < W:
                        M[:, ih, iw, :, oh, ow] += w[:, :, kh, kw].T
    return M.reshape(Cin * H * W, Cout * OH * OW), (OH, OW)


def init_raw_params(key, in_channels, num_domain):
    ks = jax.random.split(key, 7)
    return {
        "w1": 0.1 * jax.random.normal(ks[0], (32, in_channels, 5, 5), jnp.float32),
        "w2": 0.1 * jax.random.normal(ks[1], (64, 32, 5, 5), jnp.float32),
        "w3": 0.1 * jax.random.normal(ks[2], (128, 64, 5, 5), jnp.float32),
        "wd1": 0.1 * jax.random.normal(ks[3], (10, 128), jnp.float32),
        "bd1": 0.1 * jax.random.normal(ks[4], (10,), jnp.float32),
        "wd2": 0.1 * jax.random.normal(ks[5], (num_domain, 10), jnp.float32),
        "bd2": 0.1 * jax.random.normal(ks[6], (num_domain,), jnp.float32),
    }


def prepare_kernel_params(raw, T, H, W, compute_dtype=jnp.bfloat16):
    """Fold conv1..3 (identity LeakyReLU) + dense1 into one (T*F0, 128) matrix.

    All fusion math is done in float64 so the single cast to `compute_dtype`
    is the only rounding-order change vs. the layer-by-layer reference.
    """
    m1, (h1, w1s) = _conv_unrolled_matrix(np.asarray(raw["w1"]), H, W)
    m2, (h2, w2s) = _conv_unrolled_matrix(np.asarray(raw["w2"]), h1, w1s)
    m3, (h3, w3s) = _conv_unrolled_matrix(np.asarray(raw["w3"]), h2, w2s)
    assert (h3, w3s) == (1, 1), "dense expects 128*1*1 features (input must be 8x8)"

    wd1 = np.asarray(raw["wd1"], np.float64)        # (10, 128)
    bd1 = np.asarray(raw["bd1"], np.float64)        # (10,)
    wd2 = np.asarray(raw["wd2"], np.float64)        # (num_domain, 10)
    bd2 = np.asarray(raw["bd2"], np.float64)        # (num_domain,)
    hidden = wd1.shape[0]
    num_domain = wd2.shape[0]

    # Exact fusion (LeakyReLU slope 1.0 == identity): (F0, hidden)
    m_fused = m1 @ m2 @ m3 @ wd1.T
    F0 = m_fused.shape[0]

    # Lane-dense padding: hidden 10 -> 128, num_domain -> multiple of 128.
    HPAD = 128
    NPAD = _round_up(max(num_domain, 1), 128)

    # Fold the torch.sum(x, 1) into the matmul K dim: tile T times vertically.
    w_big = np.zeros((T * F0, HPAD), np.float64)
    w_big[:, :hidden] = np.tile(m_fused, (T, 1))

    b1p = np.zeros((1, HPAD), np.float32); b1p[0, :hidden] = bd1
    w2p = np.zeros((HPAD, NPAD), np.float32); w2p[:hidden, :num_domain] = wd2.T
    b2p = np.zeros((1, NPAD), np.float32); b2p[0, :num_domain] = bd2

    return {
        "w_fused": jnp.asarray(w_big.astype(np.float32), dtype=compute_dtype),
        "b1_pad": jnp.asarray(b1p),
        "w2_pad": jnp.asarray(w2p),
        "b2_pad": jnp.asarray(b2p),
        "num_domain": num_domain,
    }


# ----------------------------------------------------------------------------
# Pure-numpy float64 reference (direct conv loops) for validation.
# ----------------------------------------------------------------------------
def _conv2d_ref(x, w, stride=2, pad=2):
    B, Cin, H, W = x.shape
    Cout, _, KH, KW = w.shape
    OH = (H + 2 * pad - KH) // stride + 1
    OW = (W + 2 * pad - KW) // stride + 1
    xp = np.zeros((B, Cin, H + 2 * pad, W + 2 * pad), dtype=np.float64)
    xp[:, :, pad:pad + H, pad:pad + W] = x
    out = np.zeros((B, Cout, OH, OW), dtype=np.float64)
    for oh in range(OH):
        for ow in range(OW):
            patch = xp[:, :, oh * stride:oh * stride + KH, ow * stride:ow * stride + KW]
            out[:, :, oh, ow] = np.einsum("bchw,dchw->bd", patch, w)
    return out


def reference_forward_numpy(x, raw):
    x = np.asarray(x, dtype=np.float64)
    f = x.sum(axis=1)                                  # torch.sum(x, 1)
    # torch.squeeze(x, axis=1) is a no-op for in_channels != 1
    for wname in ("w1", "w2", "w3"):
        f = _conv2d_ref(f, np.asarray(raw[wname], dtype=np.float64))
        f = np.where(f >= 0, f, LEAKY_SLOPE * f)       # nn.LeakyReLU(True)
    f = f.reshape(f.shape[0], -1)
    f = f @ np.asarray(raw["wd1"], np.float64).T + np.asarray(raw["bd1"], np.float64)
    f = np.maximum(f, 0.0)                             # nn.ReLU(True)
    f = f @ np.asarray(raw["wd2"], np.float64).T + np.asarray(raw["bd2"], np.float64)
    return f


if __name__ == "__main__":
    key = jax.random.PRNGKey(0)
    # spatial must be 8x8 so that 3 stride-2 convs reach 1x1 (dense sees 128*1*1)
    B, T, Cin, H, W = 2, 4, 4, 8, 8
    num_domain = 3

    kx, kp = jax.random.split(key)
    x = jax.random.normal(kx, (B, T, Cin, H, W), jnp.float32)
    raw = init_raw_params(kp, Cin, num_domain)
    ref = reference_forward_numpy(np.asarray(x), raw)

    # f32 path: exact semantics check (tight tolerance).
    params_f32 = prepare_kernel_params(raw, T, H, W, compute_dtype=jnp.float32)
    out_f32 = jax.block_until_ready(domain_discriminator_forward(x, params_f32))
    np.testing.assert_allclose(np.asarray(out_f32), ref, rtol=2e-2, atol=2e-2)

    # bf16 path (default, HBM-optimized): looser tolerance for input/weight quantization.
    params_bf16 = prepare_kernel_params(raw, T, H, W, compute_dtype=jnp.bfloat16)
    out_bf16 = jax.block_until_ready(domain_discriminator_forward(x, params_bf16))
    np.testing.assert_allclose(np.asarray(out_bf16), ref, rtol=1e-1, atol=1e-1)

    print("KERNEL_OK")
</pallas_src>

<mosaic_0001>
module attributes {stable_mosaic.version = 11 : i64} {
  func.func @_dd_kernel(%arg0: i32, %arg1: memref<8x1024xf32, #tpu.memory_space<vmem>>, %arg2: memref<1024x128xf32, #tpu.memory_space<vmem>>, %arg3: memref<1x128xf32, #tpu.memory_space<vmem>>, %arg4: memref<128x128xf32, #tpu.memory_space<vmem>>, %arg5: memref<1x128xf32, #tpu.memory_space<vmem>>, %arg6: memref<8x128xf32, #tpu.memory_space<vmem>>) attributes {dimension_semantics = [#tpu.dimension_semantics<parallel>], iteration_bounds = array<i64: 1>, scalar_prefetch = 0 : i64, scratch_operands = 0 : i64, tpu.core_type = #tpu.core_type<tc>, window_params = [{transform_indices = @transform_0, window_bounds = array<i64: 8, 1024>}, {pipeline_mode = #tpu.pipeline_mode<synchronous>, transform_indices = @transform_1, window_bounds = array<i64: 1024, 128>}, {pipeline_mode = #tpu.pipeline_mode<synchronous>, transform_indices = @transform_2, window_bounds = array<i64: 1, 128>}, {pipeline_mode = #tpu.pipeline_mode<synchronous>, transform_indices = @transform_3, window_bounds = array<i64: 128, 128>}, {pipeline_mode = #tpu.pipeline_mode<synchronous>, transform_indices = @transform_4, window_bounds = array<i64: 1, 128>}, {transform_indices = @transform_5, window_bounds = array<i64: 8, 128>}]} {
    %c0 = arith.constant 0 : index
    %c0_0 = arith.constant 0 : index
    %0 = vector.load %arg1[%c0, %c0_0] : memref<8x1024xf32, #tpu.memory_space<vmem>>, vector<8x1024xf32>
    %c0_1 = arith.constant 0 : index
    %c0_2 = arith.constant 0 : index
    %1 = vector.load %arg2[%c0_1, %c0_2] : memref<1024x128xf32, #tpu.memory_space<vmem>>, vector<1024x128xf32>
    %cst = arith.constant dense<0.000000e+00> : vector<8x128xf32>
    %2 = tpu.matmul %0, %1, %cst {dimension_numbers = #tpu.dot_dimension_numbers<[1], [0], [0], [1], [0, 0, 1, 1], [], []>} : vector<8x1024xf32>, vector<1024x128xf32>, vector<8x128xf32> -> vector<8x128xf32>
    %c0_3 = arith.constant 0 : index
    %c0_4 = arith.constant 0 : index
    %3 = vector.load %arg3[%c0_3, %c0_4] : memref<1x128xf32, #tpu.memory_space<vmem>>, vector<1x128xf32>
    %4 = vector.broadcast %3 : vector<1x128xf32> to vector<8x128xf32>
    %5 = arith.addf %2, %4 : vector<8x128xf32>
    %cst_5 = arith.constant 0.000000e+00 : f32
    %6 = vector.broadcast %cst_5 : f32 to vector<8x128xf32>
    %7 = arith.maximumf %5, %6 : vector<8x128xf32>
    %c0_6 = arith.constant 0 : index
    %c0_7 = arith.constant 0 : index
    %8 = vector.load %arg4[%c0_6, %c0_7] : memref<128x128xf32, #tpu.memory_space<vmem>>, vector<128x128xf32>
    %cst_8 = arith.constant dense<0.000000e+00> : vector<8x128xf32>
    %9 = tpu.matmul %7, %8, %cst_8 {dimension_numbers = #tpu.dot_dimension_numbers<[1], [0], [0], [1], [0, 0, 1, 1], [], []>} : vector<8x128xf32>, vector<128x128xf32>, vector<8x128xf32> -> vector<8x128xf32>
    %c0_9 = arith.constant 0 : index
    %c0_10 = arith.constant 0 : index
    %10 = vector.load %arg5[%c0_9, %c0_10] : memref<1x128xf32, #tpu.memory_space<vmem>>, vector<1x128xf32>
    %11 = vector.broadcast %10 : vector<1x128xf32> to vector<8x128xf32>
    %12 = arith.addf %9, %11 : vector<8x128xf32>
    %c0_11 = arith.constant 0 : index
    %c0_12 = arith.constant 0 : index
    %13 = vector.load %arg6[%c0_11, %c0_12] : memref<8x128xf32, #tpu.memory_space<vmem>>, vector<8x128xf32>
    tpu.vector_store %arg6[%c0_11, %c0_12], %12 {strides = array<i32>} : memref<8x128xf32, #tpu.memory_space<vmem>>, vector<8x128xf32>,
    return
  }
  func.func @transform_0(%arg0: i32) -> (i32, i32) {
    %c0_i32 = arith.constant 0 : i32
    %c0_i32_0 = arith.constant 0 : i32
    return %arg0, %c0_i32 : i32, i32
  }
  func.func @transform_1(%arg0: i32) -> (i32, i32) {
    %c0_i32 = arith.constant 0 : i32
    %c0_i32_0 = arith.constant 0 : i32
    %c0_i32_1 = arith.constant 0 : i32
    return %c0_i32, %c0_i32_0 : i32, i32
  }
  func.func @transform_2(%arg0: i32) -> (i32, i32) {
    %c0_i32 = arith.constant 0 : i32
    %c0_i32_0 = arith.constant 0 : i32
    %c0_i32_1 = arith.constant 0 : i32
    return %c0_i32, %c0_i32_0 : i32, i32
  }
  func.func @transform_3(%arg0: i32) -> (i32, i32) {
    %c0_i32 = arith.constant 0 : i32
    %c0_i32_0 = arith.constant 0 : i32
    %c0_i32_1 = arith.constant 0 : i32
    return %c0_i32, %c0_i32_0 : i32, i32
  }
  func.func @transform_4(%arg0: i32) -> (i32, i32) {
    %c0_i32 = arith.constant 0 : i32
    %c0_i32_0 = arith.constant 0 : i32
    %c0_i32_1 = arith.constant 0 : i32
    return %c0_i32, %c0_i32_0 : i32, i32
  }
  func.func @transform_5(%arg0: i32) -> (i32, i32) {
    %c0_i32 = arith.constant 0 : i32
    %c0_i32_0 = arith.constant 0 : i32
    return %arg0, %c0_i32 : i32, i32
  }
}

</mosaic_0001>

<bundles_post_ra>
// kernel: tpu_custom_call.1
= control target key start
LH: loop header
LB: loop body
LE: loop exit
PB: predicated region body
PF: predicated region fallthrough
CT: control target
= control target key end

     0   :  { %10 = vsyncpa [#allocation3], 0  ;;  %s1142_s0 = inlined_call_operand.hbm [shape: f32[8,1024], index: 0, kind: input, shape index: {}]   ;;  %s1143_s1 = inlined_call_operand.hbm [shape: f32[1024,128], index: 1, kind: input, shape index: {}]   ;;  %s1144_s2 = inlined_call_operand.vmem [shape: f32[1,128], index: 2, kind: input, shape index: {}]   ;;  %s1145_s3 = inlined_call_operand.hbm [shape: f32[128,128], index: 3, kind: input, shape index: {}]   ;;  %s1146_s4 = inlined_call_operand.vmem [shape: f32[1,128], index: 4, kind: input, shape index: {}]   ;;  %s1147_s5 = inlined_call_operand.hbm [shape: f32[8,128], index: 5, kind: output, shape index: {}]  }
   0x1   :  { %11 = vsyncpa [#allocation6], 0 }
   0x2   :  { %12 = vsyncpa [#allocation4], 0  ;;  %s1043_s18 = smov [#allocation5]   ;;  %s949_s22 = scalar_lea.hbm %s1143_s1, 16384 }
   0x3   :  { %s28_s19 = sshll.u32 %s1043_s18, 4  ;;  %p950_p0 = scmp.ne.s32.totalorder %s1143_s1, %s949_s22  ;;  %s29_s19 = int_to_ptr.vmem [resolvable:$true] %s28_s19 }
   0x4   :  { %p953_p1 = scmp.lt.u32.totalorder %s949_s22, %s1143_s1 }
   0x6   :  { %p955_p2 = pnand %p953_p1, %p950_p0 }
   0x8   :  { %958 = shalt.err (!%p955_p2)
}
   0x9   :  { %s959_s27 = scalar_lea.vmem %s29_s19, 16384  ;;  %p964_p4 = scmp.lt.s32.totalorder %s29_s19, %s29_s19 }
   0xa   :  { %p960_p3 = scmp.ne.s32.totalorder %s29_s19, %s959_s27  ;;  %p965_p5 = scmp.lt.s32.totalorder %s959_s27, %s959_s27 }
   0xc   :  { %p966_p6 = por %p965_p5, %p964_p4 }
   0xe   :  { %p967_p7 = pnand %p966_p6, %p960_p3 }
  0x10   :  { %970 = shalt.err (!%p967_p7)
}
  0x11   :  { %s1044_s28 = smov 128   ;;  %s1045_s29 = smov 8  }
  0x12   :  { %34 = dma.hbm_to_vmem [thread:$0]  %s1143_s1, 16384, %s29_s19, [#allocation6], %s1044_s28, %s1044_s28, %s1045_s29  }
  0x13   :  { %s1046_s7 = smov [#allocation2]   ;;  %s1047_s9 = smov [#allocation7]  }
  0x14   :  { %s19_s8 = sshll.u32 %s1046_s7, 4  ;;  %s42_s10 = sshll.u32 %s1047_s9, 4  ;;  %s20_s8 = int_to_ptr.vmem [resolvable:$true] %s19_s8  ;;  %s43_s10 = int_to_ptr.vmem [resolvable:$true] %s42_s10 }
  0x15   :  { %s971_s13 = scalar_lea.hbm %s1142_s0, 1024 }
  0x16   :  { %p972_p8 = scmp.ne.s32.totalorder %s1142_s0, %s971_s13  ;;  %p975_p9 = scmp.lt.u32.totalorder %s971_s13, %s1142_s0 }
  0x18   :  { %p977_p10 = pnand %p975_p9, %p972_p8 }
  0x1a   :  { %980 = shalt.err (!%p977_p10)
}
  0x1b   :  { %s981_s1 = scalar_lea.vmem %s20_s8, 1024  ;;  %p986_p12 = scmp.lt.s32.totalorder %s20_s8, %s20_s8 }
  0x1c   :  { %p982_p11 = scmp.ne.s32.totalorder %s20_s8, %s981_s1  ;;  %p987_p13 = scmp.lt.s32.totalorder %s981_s1, %s981_s1 }
  0x1e   :  { %p988_p0 = por %p987_p13, %p986_p12 }
  0x20   :  { %p989_p1 = pnand %p988_p0, %p982_p11 }
  0x22   :  { %992 = shalt.err (!%p989_p1)
}
  0x23   :  { %22 = dma.hbm_to_vmem [thread:$0]  %s1142_s0, 1024, %s20_s8, [#allocation3]  }
  0x24   :  { %s993_s22 = scalar_lea.hbm %s1145_s3, 2048 }
  0x25   :  { %p994_p2 = scmp.ne.s32.totalorder %s1145_s3, %s993_s22  ;;  %p997_p3 = scmp.lt.u32.totalorder %s993_s22, %s1145_s3 }
  0x27   :  { %p999_p4 = pnand %p997_p3, %p994_p2 }
  0x29   :  { %1002 = shalt.err (!%p999_p4)
}
  0x2a   :  { %s1003_s27 = scalar_lea.vmem %s43_s10, 2048  ;;  %p1008_p6 = scmp.lt.s32.totalorder %s43_s10, %s43_s10 }
  0x2b   :  { %p1004_p5 = scmp.ne.s32.totalorder %s43_s10, %s1003_s27  ;;  %p1009_p7 = scmp.lt.s32.totalorder %s1003_s27, %s1003_s27 }
  0x2d   :  { %p1010_p8 = por %p1009_p7, %p1008_p6 }
  0x2f   :  { %p1011_p9 = pnand %p1010_p8, %p1004_p5 }
  0x31   :  { %1014 = shalt.err (!%p1011_p9)
}
  0x32   :  { %48 = dma.hbm_to_vmem [thread:$0]  %s1145_s3, 2048, %s43_s10, [#allocation6], %s1044_s28, %s1044_s28, %s1045_s29  }
  0x33   :  { %1037 = dma.done.wait [#allocation3], 1024  }
  0x34   :  { %1038 = vsyncadd [#allocation3], 4294966272 }
  0x35   :  { %1039 = dma.done.wait [#allocation6], 18432  }
  0x36   :  { %1040 = vsyncadd [#allocation6], 4294948864  ;;  %v84_v0 = vld [vmem:[#allocation5 + $0x80] sm:$0xff]  ;;  %v85_v1 = vld [vmem:[#allocation5 + $0x88] sm:$0xff]  ;;  %vm1049_vm0 = vmmov 0  }
  0x37   :  { %v68_v2 = vld [vmem:[#allocation5] sm:$0xff]  ;;  %v788_v3 = vpack.c.bf16 %v85_v1, %v84_v0  ;;  %v69_v4 = vld [vmem:[#allocation5 + $0x8] sm:$0xff]  ;;  %v86_v11 = vld [vmem:[#allocation5 + $0x90] sm:$0xff] }
  0x38   :  { %v116_v5 = vld [vmem:[#allocation5 + $0x180] sm:$0xff]  ;;  %v117_v6 = vld [vmem:[#allocation5 + $0x188] sm:$0xff]  ;;  %v790_v7 = vpack.c.bf16 %v69_v4, %v68_v2  ;;  %v87_v13 = vld [vmem:[#allocation5 + $0x98] sm:$0xff] }
  0x39   :  { %v820_v8 = vpack.c.bf16 %v117_v6, %v116_v5  ;;  %v100_v9 = vld [vmem:[#allocation5 + $0x100] sm:$0xff]  ;;  %v101_v10 = vld [vmem:[#allocation5 + $0x108] sm:$0xff]  ;;  %789 = vmatprep.subr.bf16.mxu0 %v788_v3  ;;  %v70_v14 = vld [vmem:[#allocation5 + $0x10] sm:$0xff]  ;;  %v792_v16 = vpack.c.bf16 %v87_v13, %v86_v11 }
  0x3a   :  { %v822_v12 = vpack.c.bf16 %v101_v10, %v100_v9  ;;  %v71_v15 = vld [vmem:[#allocation5 + $0x18] sm:$0xff]  ;;  %791 = vmatpush3.bf16.msra.mxu0 %v790_v7  ;;  %v118_v18 = vld [vmem:[#allocation5 + $0x190] sm:$0xff]  ;;  %v88_v23 = vld [vmem:[#allocation5 + $0xa0] sm:$0xff] }
  0x3b   :  { %821 = vmatprep.subr.bf16.mxu1 %v820_v8  ;;  %v794_v17 = vpack.c.bf16 %v71_v15, %v70_v14  ;;  %v119_v19 = vld [vmem:[#allocation5 + $0x198] sm:$0xff]  ;;  %v102_v20 = vld [vmem:[#allocation5 + $0x110] sm:$0xff]  ;;  %v89_v24 = vld [vmem:[#allocation5 + $0xa8] sm:$0xff]  ;;  %793 = vmatprep.subr.bf16.mxu0 %v792_v16 }
  0x3c   :  { %823 = vmatpush3.bf16.msra.mxu1 %v822_v12  ;;  %v824_v21 = vpack.c.bf16 %v119_v19, %v118_v18  ;;  %v103_v22 = vld [vmem:[#allocation5 + $0x118] sm:$0xff]  ;;  %v796_v26 = vpack.c.bf16 %v89_v24, %v88_v23  ;;  %v72_v27 = vld [vmem:[#allocation5 + $0x20] sm:$0xff]  ;;  %v73_v28 = vld [vmem:[#allocation5 + $0x28] sm:$0xff] }
  0x3d   :  { %v826_v25 = vpack.c.bf16 %v103_v22, %v102_v20  ;;  %v120_v29 = vld [vmem:[#allocation5 + $0x1a0] sm:$0xff]  ;;  %v121_v30 = vld [vmem:[#allocation5 + $0x1a8] sm:$0xff]  ;;  %v798_v33 = vpack.c.bf16 %v73_v28, %v72_v27  ;;  %v90_v35 = vld [vmem:[#allocation5 + $0xb0] sm:$0xff] }
  0x3e   :  { %825 = vmatprep.subr.bf16.mxu1 %v824_v21  ;;  %v104_v31 = vld [vmem:[#allocation5 + $0x120] sm:$0xff]  ;;  %v105_v32 = vld [vmem:[#allocation5 + $0x128] sm:$0xff]  ;;  %795 = vmatpush3.bf16.msra.mxu0 %v794_v17  ;;  %v828_v34 = vpack.c.bf16 %v121_v30, %v120_v29  ;;  %v91_v36 = vld [vmem:[#allocation5 + $0xb8] sm:$0xff] }
  0x3f   :  { %v74_v37 = vld [vmem:[#allocation5 + $0x30] sm:$0xff]  ;;  %797 = vmatprep.subr.bf16.mxu0 %v796_v26  ;;  %v830_v38 = vpack.c.bf16 %v105_v32, %v104_v31  ;;  %v800_v39 = vpack.c.bf16 %v91_v36, %v90_v35  ;;  %v75_v40 = vld [vmem:[#allocation5 + $0x38] sm:$0xff]  ;;  %v92_v46 = vld [vmem:[#allocation5 + $0xc0] sm:$0xff] }
  0x40   :  { %827 = vmatpush3.bf16.msra.mxu1 %v826_v25  ;;  %v122_v41 = vld [vmem:[#allocation5 + $0x1b0] sm:$0xff]  ;;  %v123_v42 = vld [vmem:[#allocation5 + $0x1b8] sm:$0xff]  ;;  %v93_v47 = vld [vmem:[#allocation5 + $0xc8] sm:$0xff]  ;;  %v802_v48 = vpack.c.bf16 %v75_v40, %v74_v37 }
  0x41   :  { %829 = vmatprep.subr.bf16.mxu1 %v828_v34  ;;  %v832_v43 = vpack.c.bf16 %v123_v42, %v122_v41  ;;  %v106_v44 = vld [vmem:[#allocation5 + $0x130] sm:$0xff]  ;;  %v107_v45 = vld [vmem:[#allocation5 + $0x138] sm:$0xff]  ;;  %v124_v49 = vld [vmem:[#allocation5 + $0x1c0] sm:$0xff]  ;;  %v804_v52 = vpack.c.bf16 %v93_v47, %v92_v46 }
  0x42   :  { %799 = vmatpush3.bf16.msra.mxu0 %v798_v33  ;;  %v125_v50 = vld [vmem:[#allocation5 + $0x1c8] sm:$0xff]  ;;  %v834_v51 = vpack.c.bf16 %v107_v45, %v106_v44  ;;  %v76_v53 = vld [vmem:[#allocation5 + $0x40] sm:$0xff]  ;;  %v94_v58 = vld [vmem:[#allocation5 + $0xd0] sm:$0xff] }
  0x43   :  { %801 = vmatprep.subr.bf16.mxu0 %v800_v39  ;;  %v77_v54 = vld [vmem:[#allocation5 + $0x48] sm:$0xff]  ;;  %v108_v55 = vld [vmem:[#allocation5 + $0x140] sm:$0xff]  ;;  %v836_v56 = vpack.c.bf16 %v125_v50, %v124_v49  ;;  %v95_v59 = vld [vmem:[#allocation5 + $0xd8] sm:$0xff] }
  0x44   :  { %831 = vmatpush3.bf16.msra.mxu1 %v830_v38  ;;  %v109_v57 = vld [vmem:[#allocation5 + $0x148] sm:$0xff]  ;;  %v126_v60 = vld [vmem:[#allocation5 + $0x1d0] sm:$0xff]  ;;  %v127_v61 = vld [vmem:[#allocation5 + $0x1d8] sm:$0xff]  ;;  %v806_v62 = vpack.c.bf16 %v77_v54, %v76_v53  ;;  %v808_v0 = vpack.c.bf16 %v95_v59, %v94_v58 }
  0x45   :  { %833 = vmatprep.subr.bf16.mxu1 %v832_v43  ;;  %v838_v63 = vpack.c.bf16 %v109_v57, %v108_v55  ;;  %v78_v1 = vld [vmem:[#allocation5 + $0x50] sm:$0xff]  ;;  %v79_v2 = vld [vmem:[#allocation5 + $0x58] sm:$0xff]  ;;  %v840_v4 = vpack.c.bf16 %v127_v61, %v126_v60  ;;  %v96_v6 = vld [vmem:[#allocation5 + $0xe0] sm:$0xff] }
  0x46   :  { %803 = vmatpush3.bf16.msra.mxu0 %v802_v48  ;;  %v110_v3 = vld [vmem:[#allocation5 + $0x150] sm:$0xff]  ;;  %v111_v5 = vld [vmem:[#allocation5 + $0x158] sm:$0xff]  ;;  %v97_v7 = vld [vmem:[#allocation5 + $0xe8] sm:$0xff]  ;;  %v810_v10 = vpack.c.bf16 %v79_v2, %v78_v1 }
  0x47   :  { %805 = vmatprep.subr.bf16.mxu0 %v804_v52  ;;  %v128_v8 = vld [vmem:[#allocation5 + $0x1e0] sm:$0xff]  ;;  %v129_v9 = vld [vmem:[#allocation5 + $0x1e8] sm:$0xff]  ;;  %v842_v13 = vpack.c.bf16 %v111_v5, %v110_v3  ;;  %v812_v14 = vpack.c.bf16 %v97_v7, %v96_v6  ;;  %v98_v19 = vld [vmem:[#allocation5 + $0xf0] sm:$0xff] }
  0x48   :  { %835 = vmatpush3.bf16.msra.mxu1 %v834_v51  ;;  %v80_v11 = vld [vmem:[#allocation5 + $0x60] sm:$0xff]  ;;  %v81_v12 = vld [vmem:[#allocation5 + $0x68] sm:$0xff]  ;;  %v844_v18 = vpack.c.bf16 %v129_v9, %v128_v8  ;;  %v99_v20 = vld [vmem:[#allocation5 + $0xf8] sm:$0xff] }
  0x49   :  { %837 = vmatprep.subr.bf16.mxu1 %v836_v56  ;;  %v112_v15 = vld [vmem:[#allocation5 + $0x160] sm:$0xff]  ;;  %v113_v16 = vld [vmem:[#allocation5 + $0x168] sm:$0xff]  ;;  %v63_v21 = vld [vmem:[#allocation2 + $0x18] sm:$0xff]  ;;  %v814_v24 = vpack.c.bf16 %v81_v12, %v80_v11  ;;  %v816_v26 = vpack.c.bf16 %v99_v20, %v98_v19 }
  0x4a   :  { %807 = vmatpush3.bf16.msra.mxu0 %v806_v62  ;;  %v61_v17 = vld [vmem:[#allocation2 + $0x8] sm:$0xff]  ;;  %v130_v22 = vld [vmem:[#allocation5 + $0x1f0] sm:$0xff]  ;;  %v131_v23 = vld [vmem:[#allocation5 + $0x1f8] sm:$0xff]  ;;  %337 = vmatprep.mubr.f32.mxu1 %v63_v21  ;;  %v846_v25 = vpack.c.bf16 %v113_v16, %v112_v15 }
  0x4b   :  { %809 = vmatprep.subr.bf16.mxu0 %v808_v0  ;;  %267 = vmatprep.mubr.f32.mxu0 %v61_v17  ;;  %v82_v27 = vld [vmem:[#allocation5 + $0x70] sm:$0xff]  ;;  %v83_v28 = vld [vmem:[#allocation5 + $0x78] sm:$0xff]  ;;  %v848_v30 = vpack.c.bf16 %v131_v23, %v130_v22  ;;  %v148_v32 = vld [vmem:[#allocation5 + $0x280] sm:$0xff] }
  0x4c   :  { %839 = vmatpush3.bf16.msra.mxu1 %v838_v63  ;;  %v114_v29 = vld [vmem:[#allocation5 + $0x170] sm:$0xff]  ;;  %v115_v31 = vld [vmem:[#allocation5 + $0x178] sm:$0xff]  ;;  %v149_v33 = vld [vmem:[#allocation5 + $0x288] sm:$0xff]  ;;  %v818_v36 = vpack.c.bf16 %v83_v28, %v82_v27 }
  0x4d   :  { %841 = vmatprep.subr.bf16.mxu1 %v840_v4  ;;  %v180_v34 = vld [vmem:[#allocation5 + $0x380] sm:$0xff]  ;;  %v181_v35 = vld [vmem:[#allocation5 + $0x388] sm:$0xff]  ;;  %v850_v37 = vpack.c.bf16 %v115_v31, %v114_v29  ;;  %v852_v38 = vpack.c.bf16 %v149_v33, %v148_v32  ;;  %v150_v44 = vld [vmem:[#allocation5 + $0x290] sm:$0xff] }
  0x4e   :  { %811 = vmatpush3.bf16.msra.mxu0 %v810_v10  ;;  %v132_v39 = vld [vmem:[#allocation5 + $0x200] sm:$0xff]  ;;  %v133_v40 = vld [vmem:[#allocation5 + $0x208] sm:$0xff]  ;;  %v884_v42 = vpack.c.bf16 %v181_v35, %v180_v34  ;;  %v151_v45 = vld [vmem:[#allocation5 + $0x298] sm:$0xff] }
  0x4f   :  { %813 = vmatprep.subr.bf16.mxu0 %v812_v14  ;;  %v164_v41 = vld [vmem:[#allocation5 + $0x300] sm:$0xff]  ;;  %v165_v43 = vld [vmem:[#allocation5 + $0x308] sm:$0xff]  ;;  %v182_v46 = vld [vmem:[#allocation5 + $0x390] sm:$0xff]  ;;  %v854_v49 = vpack.c.bf16 %v133_v40, %v132_v39  ;;  %v856_v52 = vpack.c.bf16 %v151_v45, %v150_v44 }
  0x50   :  { %843 = vmatpush3.bf16.msra.mxu1 %v842_v13  ;;  %v183_v47 = vld [vmem:[#allocation5 + $0x398] sm:$0xff]  ;;  %v60_v48 = vld [vmem:[#allocation2] sm:$0xff]  ;;  %v62_v50 = vld [vmem:[#allocation2 + $0x10] sm:$0xff]  ;;  %v886_v51 = vpack.c.bf16 %v165_v43, %v164_v41 }
  0x51   :  { %845 = vmatprep.subr.bf16.mxu1 %v844_v18  ;;  %v134_v53 = vld [vmem:[#allocation5 + $0x210] sm:$0xff]  ;;  %v135_v54 = vld [vmem:[#allocation5 + $0x218] sm:$0xff]  ;;  %v888_v56 = vpack.c.bf16 %v183_v47, %v182_v46  ;;  %v152_v58 = vld [vmem:[#allocation5 + $0x2a0] sm:$0xff] }
  0x52   :  { %815 = vmatpush3.bf16.msra.mxu0 %v814_v24  ;;  %v166_v55 = vld [vmem:[#allocation5 + $0x310] sm:$0xff]  ;;  %v167_v57 = vld [vmem:[#allocation5 + $0x318] sm:$0xff]  ;;  %v153_v59 = vld [vmem:[#allocation5 + $0x2a8] sm:$0xff]  ;;  %v858_v62 = vpack.c.bf16 %v135_v54, %v134_v53 }
  0x53   :  { %817 = vmatprep.subr.bf16.mxu0 %v816_v26  ;;  %v184_v60 = vld [vmem:[#allocation5 + $0x3a0] sm:$0xff]  ;;  %v185_v61 = vld [vmem:[#allocation5 + $0x3a8] sm:$0xff]  ;;  %v890_v63 = vpack.c.bf16 %v167_v57, %v166_v55  ;;  %v860_v0 = vpack.c.bf16 %v153_v59, %v152_v58  ;;  %v154_v6 = vld [vmem:[#allocation5 + $0x2b0] sm:$0xff] }
  0x54   :  { %847 = vmatpush3.bf16.msra.mxu1 %v846_v25  ;;  %v136_v1 = vld [vmem:[#allocation5 + $0x220] sm:$0xff]  ;;  %v137_v2 = vld [vmem:[#allocation5 + $0x228] sm:$0xff]  ;;  %v892_v4 = vpack.c.bf16 %v185_v61, %v184_v60  ;;  %v155_v7 = vld [vmem:[#allocation5 + $0x2b8] sm:$0xff] }
  0x55   :  { %849 = vmatprep.subr.bf16.mxu1 %v848_v30  ;;  %v168_v3 = vld [vmem:[#allocation5 + $0x320] sm:$0xff]  ;;  %v169_v5 = vld [vmem:[#allocation5 + $0x328] sm:$0xff]  ;;  %v186_v8 = vld [vmem:[#allocation5 + $0x3b0] sm:$0xff]  ;;  %v862_v10 = vpack.c.bf16 %v137_v2, %v136_v1  ;;  %v864_v12 = vpack.c.bf16 %v155_v7, %v154_v6 }
  0x56   :  { %819 = vmatpush3.bf16.msra.mxu0 %v818_v36  ;;  %v187_v9 = vld [vmem:[#allocation5 + $0x3b8] sm:$0xff]  ;;  %v894_v11 = vpack.c.bf16 %v169_v5, %v168_v3  ;;  %v138_v13 = vld [vmem:[#allocation5 + $0x230] sm:$0xff]  ;;  %v156_v18 = vld [vmem:[#allocation5 + $0x2c0] sm:$0xff] }
  0x57   :  { %853 = vmatprep.subr.bf16.mxu0 %v852_v38  ;;  %v139_v14 = vld [vmem:[#allocation5 + $0x238] sm:$0xff]  ;;  %v170_v15 = vld [vmem:[#allocation5 + $0x330] sm:$0xff]  ;;  %v896_v16 = vpack.c.bf16 %v187_v9, %v186_v8  ;;  %v157_v19 = vld [vmem:[#allocation5 + $0x2c8] sm:$0xff] }
  0x58   :  { %851 = vmatpush3.bf16.msra.mxu1 %v850_v37  ;;  %v171_v17 = vld [vmem:[#allocation5 + $0x338] sm:$0xff]  ;;  %v188_v20 = vld [vmem:[#allocation5 + $0x3c0] sm:$0xff]  ;;  %v189_v21 = vld [vmem:[#allocation5 + $0x3c8] sm:$0xff]  ;;  %v866_v22 = vpack.c.bf16 %v139_v14, %v138_v13  ;;  %v868_v26 = vpack.c.bf16 %v157_v19, %v156_v18 }
  0x59   :  { %885 = vmatprep.subr.bf16.mxu1 %v884_v42  ;;  %268 = vmatmul.mubr.f32.vlgmr.msra.gmra.mrb[0].mxu0 %v60_v48  ;;  %v65_v23 = vld [vmem:[#allocation2 + $0x28] sm:$0xff]  ;;  %v67_v24 = vld [vmem:[#allocation2 + $0x38] sm:$0xff]  ;;  %v898_v25 = vpack.c.bf16 %v171_v17, %v170_v15  ;;  %v140_v27 = vld [vmem:[#allocation5 + $0x240] sm:$0xff]  ;;  %v900_v30 = vpack.c.bf16 %v189_v21, %v188_v20 }
  0x5a   :  { %855 = vmatpush3.bf16.msra.mxu0 %v854_v49  ;;  %v141_v28 = vld [vmem:[#allocation5 + $0x248] sm:$0xff]  ;;  %v172_v29 = vld [vmem:[#allocation5 + $0x340] sm:$0xff]  ;;  %v158_v32 = vld [vmem:[#allocation5 + $0x2d0] sm:$0xff]  ;;  %407 = vmatprep.mubr.f32.mxu0 %v65_v23 }
  0x5b   :  { %338 = vmatmul.mubr.f32.vlgmr.msra.gmra.mrb[0].mxu1 %v62_v50  ;;  %857 = vmatprep.subr.bf16.mxu0 %v856_v52  ;;  %v173_v31 = vld [vmem:[#allocation5 + $0x348] sm:$0xff]  ;;  %v159_v33 = vld [vmem:[#allocation5 + $0x2d8] sm:$0xff]  ;;  %v190_v34 = vld [vmem:[#allocation5 + $0x3d0] sm:$0xff]  ;;  %v870_v36 = vpack.c.bf16 %v141_v28, %v140_v27 }
  0x5c   :  { %887 = vmatpush3.bf16.msra.mxu1 %v886_v51  ;;  %v191_v35 = vld [vmem:[#allocation5 + $0x3d8] sm:$0xff]  ;;  %477 = vmatprep.mubr.f32.mxu1 %v67_v24  ;;  %v902_v37 = vpack.c.bf16 %v173_v31, %v172_v29  ;;  %v872_v38 = vpack.c.bf16 %v159_v33, %v158_v32  ;;  %v142_v39 = vld [vmem:[#allocation5 + $0x250] sm:$0xff]  ;;  %v160_v44 = vld [vmem:[#allocation5 + $0x2e0] sm:$0xff]  ;;  %v1050_v33 = vmov 0.0  }
  0x5d   :  { %889 = vmatprep.subr.bf16.mxu1 %v888_v56  ;;  %v143_v40 = vld [vmem:[#allocation5 + $0x258] sm:$0xff]  ;;  %v174_v41 = vld [vmem:[#allocation5 + $0x350] sm:$0xff]  ;;  %v904_v42 = vpack.c.bf16 %v191_v35, %v190_v34  ;;  %v161_v45 = vld [vmem:[#allocation5 + $0x2e8] sm:$0xff] }
  0x5e   :  { %859 = vmatpush3.bf16.msra.mxu0 %v858_v62  ;;  %v175_v43 = vld [vmem:[#allocation5 + $0x358] sm:$0xff]  ;;  %v192_v46 = vld [vmem:[#allocation5 + $0x3e0] sm:$0xff]  ;;  %v193_v47 = vld [vmem:[#allocation5 + $0x3e8] sm:$0xff]  ;;  %v874_v48 = vpack.c.bf16 %v143_v40, %v142_v39  ;;  %v876_v50 = vpack.c.bf16 %v161_v45, %v160_v44 }
  0x5f   :  { %861 = vmatprep.subr.bf16.mxu0 %v860_v0  ;;  %v906_v49 = vpack.c.bf16 %v175_v43, %v174_v41  ;;  %v144_v51 = vld [vmem:[#allocation5 + $0x260] sm:$0xff]  ;;  %v145_v52 = vld [vmem:[#allocation5 + $0x268] sm:$0xff]  ;;  %v908_v54 = vpack.c.bf16 %v193_v47, %v192_v46  ;;  %v162_v56 = vld [vmem:[#allocation5 + $0x2f0] sm:$0xff] }
  0x60   :  { %891 = vmatpush3.bf16.msra.mxu1 %v890_v63  ;;  %v176_v53 = vld [vmem:[#allocation5 + $0x360] sm:$0xff]  ;;  %v177_v55 = vld [vmem:[#allocation5 + $0x368] sm:$0xff]  ;;  %v163_v57 = vld [vmem:[#allocation5 + $0x2f8] sm:$0xff]  ;;  %v878_v60 = vpack.c.bf16 %v145_v52, %v144_v51 }
  0x61   :  { %893 = vmatprep.subr.bf16.mxu1 %v892_v4  ;;  %v194_v58 = vld [vmem:[#allocation5 + $0x3f0] sm:$0xff]  ;;  %v195_v59 = vld [vmem:[#allocation5 + $0x3f8] sm:$0xff]  ;;  %v910_v61 = vpack.c.bf16 %v177_v55, %v176_v53  ;;  %v880_v62 = vpack.c.bf16 %v163_v57, %v162_v56  ;;  %v64_v6 = vld [vmem:[#allocation2 + $0x20] sm:$0xff] }
  0x62   :  { %863 = vmatpush3.bf16.msra.mxu0 %v862_v10  ;;  %v146_v63 = vld [vmem:[#allocation5 + $0x270] sm:$0xff]  ;;  %v147_v0 = vld [vmem:[#allocation5 + $0x278] sm:$0xff]  ;;  %v912_v1 = vpack.c.bf16 %v195_v59, %v194_v58  ;;  %v484_v8 = vld [vmem:[#allocation7] sm:$0xff] }
  0x63   :  { %865 = vmatprep.subr.bf16.mxu0 %v864_v12  ;;  %v178_v2 = vld [vmem:[#allocation5 + $0x370] sm:$0xff]  ;;  %v179_v3 = vld [vmem:[#allocation5 + $0x378] sm:$0xff]  ;;  %v882_v4 = vpack.c.bf16 %v147_v0, %v146_v63  ;;  %v485_v9 = vld [vmem:[#allocation7 + $0x8] sm:$0xff] }
  0x64   :  { %895 = vmatpush3.bf16.msra.mxu1 %v894_v11  ;;  %v914_v5 = vpack.c.bf16 %v179_v3, %v178_v2  ;;  %v66_v7 = vld [vmem:[#allocation2 + $0x30] sm:$0xff]  ;;  %v1048_v11 = vmov 0.0|0.0   ;;  %v917_v12 = vpack.c.bf16 %v485_v9, %v484_v8  ;;  %v487_v13 = vld [vmem:[#allocation7 + $0x18] sm:$0xff]  ;;  %v488_v15 = vld [vmem:[#allocation7 + $0x20] sm:$0xff] }
  0x65   :  { %897 = vmatprep.subr.bf16.mxu1 %v896_v16  ;;  %v486_v10 = vld [vmem:[#allocation7 + $0x10] sm:$0xff]  ;;  %v489_v16 = vld [vmem:[#allocation7 + $0x28] sm:$0xff]  ;;  %v491_v19 = vld [vmem:[#allocation7 + $0x38] sm:$0xff] }
  0x66   :  { %867 = vmatpush3.bf16.msra.mxu0 %v866_v22  ;;  %v920_v14 = vpack.c.bf16 %v487_v13, %v486_v10  ;;  %v923_v17 = vpack.c.bf16 %v489_v16, %v488_v15  ;;  %v490_v18 = vld [vmem:[#allocation7 + $0x30] sm:$0xff]  ;;  %v492_v21 = vld [vmem:[#allocation7 + $0x40] sm:$0xff]  ;;  %v493_v22 = vld [vmem:[#allocation7 + $0x48] sm:$0xff] }
  0x67   :  { %869 = vmatprep.subr.bf16.mxu0 %v868_v26  ;;  %v926_v20 = vpack.c.bf16 %v491_v19, %v490_v18  ;;  %v929_v23 = vpack.c.bf16 %v493_v22, %v492_v21  ;;  %v494_v24 = vld [vmem:[#allocation7 + $0x50] sm:$0xff]  ;;  %v496_v27 = vld [vmem:[#allocation7 + $0x60] sm:$0xff]  ;;  %v497_v28 = vld [vmem:[#allocation7 + $0x68] sm:$0xff] }
  0x68   :  { %899 = vmatpush3.bf16.msra.mxu1 %v898_v25  ;;  %v495_v25 = vld [vmem:[#allocation7 + $0x58] sm:$0xff]  ;;  %v935_v29 = vpack.c.bf16 %v497_v28, %v496_v27  ;;  %v594_v35 = vld [vmem:[%s1144_s2] ss:$0 sm:$0xff]  ;;  %s1051_s2 = smov [#allocation8]  }
  0x69   :  { %901 = vmatprep.subr.bf16.mxu1 %v900_v30  ;;  %v932_v26 = vpack.c.bf16 %v495_v25, %v494_v24  ;;  %v498_v30 = vld [vmem:[#allocation7 + $0x70] sm:$0xff]  ;;  %v499_v31 = vld [vmem:[#allocation7 + $0x78] sm:$0xff]  ;;  %v595_v52 = vld [vmem:[%s1146_s4] ss:$0 sm:$0xff]  ;;  %s584_s7 = sshll.u32 %s1051_s2, 4  ;;  %s585_s7 = int_to_ptr.vmem [resolvable:$true] %s584_s7 }
  0x6a   :  { %871 = vmatpush3.bf16.msra.mxu0 %v870_v36  ;;  %v938_v32 = vpack.c.bf16 %v499_v31, %v498_v30  ;;  %s1015_s8 = scalar_lea.vmem %s585_s7, 128  ;;  %p1020_p11 = scmp.lt.s32.totalorder %s585_s7, %s585_s7 }
  0x6b   :  { %873 = vmatprep.subr.bf16.mxu0 %v872_v38  ;;  %p1016_p10 = scmp.ne.s32.totalorder %s585_s7, %s1015_s8  ;;  %p1021_p12 = scmp.lt.s32.totalorder %s1015_s8, %s1015_s8 }
  0x6c   :  { %903 = vmatpush3.bf16.msra.mxu1 %v902_v37 }
  0x6d   :  { %905 = vmatprep.subr.bf16.mxu1 %v904_v42  ;;  %p1022_p13 = por %p1021_p12, %p1020_p11 }
  0x6e   :  { %875 = vmatpush3.bf16.msra.mxu0 %v874_v48 }
  0x6f   :  { %877 = vmatprep.subr.bf16.mxu0 %v876_v50  ;;  %p1023_p0 = pnand %p1022_p13, %p1016_p10 }
  0x70   :  { %907 = vmatpush3.bf16.msra.mxu1 %v906_v49 }
  0x71   :  { %909 = vmatprep.subr.bf16.mxu1 %v908_v54 }
  0x72   :  { %879 = vmatpush3.bf16.msra.mxu0 %v878_v60 }
  0x73   :  { %881 = vmatprep.subr.bf16.mxu0 %v880_v62 }
  0x74   :  { %911 = vmatpush3.bf16.msra.mxu1 %v910_v61 }
  0x75   :  { %913 = vmatprep.subr.bf16.mxu1 %v912_v1 }
  0x76   :  { %883 = vmatpush3.bf16.msra.mxu0 %v882_v4 }
  0x77   :  { %916 = vmatprep.subr.bf16.mxu0 %v1048_v11 }
  0x78   :  { %915 = vmatpush3.bf16.msra.mxu1 %v914_v5 }
  0x79   :  { %408 = vmatmul.mubr.f32.vlgmr.msra.gmra.mrb[2].mxu0 %v64_v6 }
  0x7a   :  { %918 = vmatpush3.bf16.msra.mxu0 %v917_v12  ;;  %785 = vmatprep.mubr.msk.f32.mxu0 %vm1049_vm0, %v1050_v33 }
  0x7b   :  { %478 = vmatmul.mubr.f32.vlgmr.msra.gmra.mrb[2].mxu1 %v66_v7  ;;  %919 = vmatprep.subr.bf16.mxu0 %v1048_v11 }
  0x7e   :  { %921 = vmatpush3.bf16.msra.mxu0 %v920_v14 }
  0x7f   :  { %922 = vmatprep.subr.bf16.mxu0 %v1048_v11 }
  0x82   :  { %924 = vmatpush3.bf16.msra.mxu0 %v923_v17 }
  0x83   :  { %925 = vmatprep.subr.bf16.mxu0 %v1048_v11 }
  0x86   :  { %927 = vmatpush3.bf16.msra.mxu0 %v926_v20 }
  0x87   :  { %928 = vmatprep.subr.bf16.mxu0 %v1048_v11 }
  0x8a   :  { %930 = vmatpush3.bf16.msra.mxu0 %v929_v23 }
  0x8b   :  { %931 = vmatprep.subr.bf16.mxu0 %v1048_v11 }
  0x8e   :  { %933 = vmatpush3.bf16.msra.mxu0 %v932_v26 }
  0x8f   :  { %934 = vmatprep.subr.bf16.mxu0 %v1048_v11 }
  0x92   :  { %936 = vmatpush3.bf16.msra.mxu0 %v935_v29 }
  0x93   :  { %937 = vmatprep.subr.bf16.mxu0 %v1048_v11 }
  0x96   :  { %939 = vmatpush3.bf16.msra.mxu0 %v938_v32 }
 0x12c   :  { %v628_v34 = vpop.f32.mrb[0].mxu0 }
 0x12d   :  { %v629_v36 = vpop.f32.mrb[1].mxu0 }
 0x12e   :  { %v663_v37 = vpop.f32.mrb[0].mxu1  ;;  %v630_v38 = vadd.f32 %v629_v36, %v628_v34 }
 0x12f   :  { %v664_v39 = vpop.f32.mrb[1].mxu1 }
 0x130   :  { %v665_v40 = vadd.f32 %v664_v39, %v663_v37  ;;  %v270_v41 = vadd.f32 %v630_v38, %v594_v35 }
 0x132   :  { %v340_v42 = vadd.f32 %v665_v40, %v270_v41 }
 0x14c   :  { %v698_v43 = vpop.f32.mrb[2].mxu0 }
 0x14d   :  { %v699_v44 = vpop.f32.mrb[3].mxu0 }
 0x14e   :  { %v733_v45 = vpop.f32.mrb[2].mxu1  ;;  %v700_v46 = vadd.f32 %v699_v44, %v698_v43 }
 0x14f   :  { %v734_v47 = vpop.f32.mrb[3].mxu1 }
 0x150   :  { %v735_v48 = vadd.f32 %v734_v47, %v733_v45  ;;  %v410_v49 = vadd.f32 %v700_v46, %v340_v42 }
 0x152   :  { %v480_v50 = vadd.f32 %v735_v48, %v410_v49 }
 0x154   :  { %v483_v51 = vmax.f32 %v480_v50, 0.0 }
 0x156   :  { %786 = vmatmul.mubr.f32.vlgmr.msra.gmra.mrb[4].mxu0 %v483_v51 }
 0x229   :  { %v573_v53 = vpop.f32.mrb[4].mxu0 }
 0x22a   :  { %v574_v54 = vadd.f32 %v595_v52, %v573_v53  ;;  %v787_v55 = vpop.f32.mrb[5].mxu0 }
 0x22c   :  { %577 = vst [vmem:[#allocation8] sm:$0xff] %v574_v54 }
 0x22d   :  { %1026 = shalt.err (!%p1023_p0)
}
 0x22e   :  { %s1027_s11 = scalar_lea.hbm %s1147_s5, 128 }
 0x22f   :  { %p1028_p1 = scmp.ne.s32.totalorder %s1147_s5, %s1027_s11  ;;  %p1031_p2 = scmp.lt.u32.totalorder %s1027_s11, %s1147_s5 }
 0x231   :  { %p1033_p3 = pnand %p1031_p2, %p1028_p1 }
 0x233   :  { %1036 = shalt.err (!%p1033_p3)
}
 0x234   :  { %587 = dma.vmem_to_hbm [thread:$0]  %s585_s7, 128, %s1147_s5, [#allocation4]  }
 0x235   :  { %1041 = dma.done.wait [#allocation4], 128  }
 0x236   :  { %1042 = vsyncadd [#allocation4], 4294967168 }
 0x237   :  { %591 = vsyncpa [#allocation3], 1 }
 0x238   :  { %592 = vsyncpa [#allocation6], 1 }
 0x239   :  { %593 = vsyncpa [#allocation4], 1 }

</bundles_post_ra>
